<compile_context>
chip_gen: v7x
topology: tpu7x:2x2x1
jax: 0.10.0
libtpu: 0.0.40
codegen_flags: <defaults>
</compile_context>

<pallas_src>
import functools

import jax
import jax.numpy as jnp
from jax.experimental import pallas as pl
from jax.experimental.pallas import tpu as pltpu


NEG_INF = -1e30  # finite sentinel: avoids NaN from exp(-inf - -inf)


def _round_up(x, m):
    return ((x + m - 1) // m) * m


# -----------------------------------------------------------------------------
# Kernel 1: fused K/V projection (runs once over K/V).
# -----------------------------------------------------------------------------
def _kv_proj_kernel(k_ref, v_ref, wk_ref, wv_ref, bk_ref, bv_ref,
                    kp_ref, vp_ref, *, compute_dtype):
    cdt = compute_dtype
    kp = jnp.dot(k_ref[0].astype(cdt), wk_ref[...],
                 preferred_element_type=jnp.float32) + bk_ref[...]
    vp = jnp.dot(v_ref[0].astype(cdt), wv_ref[...],
                 preferred_element_type=jnp.float32) + bv_ref[...]
    kp_ref[0] = kp.astype(kp_ref.dtype)
    vp_ref[0] = vp.astype(vp_ref.dtype)


def _project_kv(k, v, wk, wv, bk, bv, *, tile, compute_dtype, vmem_limit_bytes):
    B, Sk, E = k.shape
    D = wk.shape[1]
    kernel = functools.partial(_kv_proj_kernel, compute_dtype=compute_dtype)
    return pl.pallas_call(
        kernel,
        out_shape=(jax.ShapeDtypeStruct((B, Sk, D), compute_dtype),
                   jax.ShapeDtypeStruct((B, Sk, D), compute_dtype)),
        grid_spec=pltpu.PrefetchScalarGridSpec(
            num_scalar_prefetch=0,
            grid=(B, Sk // tile),
            in_specs=[
                pl.BlockSpec((1, tile, E), lambda b, i: (b, i, 0)),   # k
                pl.BlockSpec((1, tile, E), lambda b, i: (b, i, 0)),   # v
                pl.BlockSpec((E, D), lambda b, i: (0, 0)),            # wk (resident)
                pl.BlockSpec((E, D), lambda b, i: (0, 0)),            # wv
                pl.BlockSpec((1, D), lambda b, i: (0, 0)),            # bk
                pl.BlockSpec((1, D), lambda b, i: (0, 0)),            # bv
            ],
            out_specs=[
                pl.BlockSpec((1, tile, D), lambda b, i: (b, i, 0)),
                pl.BlockSpec((1, tile, D), lambda b, i: (b, i, 0)),
            ]),
        compiler_params=pltpu.CompilerParams(
            dimension_semantics=("parallel", "parallel"),
            vmem_limit_bytes=vmem_limit_bytes),
    )(k, v, wk, wv, bk, bv)


# -----------------------------------------------------------------------------
# Kernel 2: flash-attention over pre-projected K/V (Q projected in-kernel once
# per q-tile), with online softmax and optional masked-tile skip.
# -----------------------------------------------------------------------------
def _flash_attn_kernel(*refs, mask_mode, has_tile_tbl, nq, nk, tk,
                       kv_valid_len, compute_dtype):
    if has_tile_tbl:
        tbl_ref = refs[0]
        refs = refs[1:]
    else:
        tbl_ref = None

    if mask_mode is None:
        (q_ref, kp_ref, vp_ref, wq_ref, bq_ref,
         o_ref, q_sc, m_sc, l_sc, acc_sc) = refs
        mask_ref = None
    else:
        (q_ref, kp_ref, vp_ref, mask_ref, wq_ref, bq_ref,
         o_ref, q_sc, m_sc, l_sc, acc_sc) = refs

    b = pl.program_id(0)
    qi = pl.program_id(1)
    ki = pl.program_id(2)
    cdt = compute_dtype

    # ---- init + Q projection: once per (batch, q-tile) ----------------------
    @pl.when(ki == 0)
    def _():
        # 1/sqrt(D) is pre-folded into wq/bq by the wrapper.
        qp = jnp.dot(q_ref[0].astype(cdt), wq_ref[...],
                     preferred_element_type=jnp.float32) + bq_ref[...]
        q_sc[...] = qp.astype(cdt)
        m_sc[...] = jnp.full_like(m_sc, NEG_INF)
        l_sc[...] = jnp.zeros_like(l_sc)
        acc_sc[...] = jnp.zeros_like(acc_sc)

    def _body():
        # scores (tq, tk): contract the head dim of Kp directly (no transpose)
        s = jax.lax.dot_general(
            q_sc[...], kp_ref[0],
            dimension_numbers=(((1,), (1,)), ((), ())),
            preferred_element_type=jnp.float32)

        if mask_mode is not None:
            keep = (mask_ref[...] if mask_mode == "2d" else mask_ref[0]) != 0
            s = jnp.where(keep, s, NEG_INF)
        if kv_valid_len is not None:
            # padded kv columns (no user mask to cover them)
            kv_pos = ki * tk + jax.lax.broadcasted_iota(jnp.int32, s.shape, 1)
            s = jnp.where(kv_pos < kv_valid_len, s, NEG_INF)

        # online softmax
        m_prev = m_sc[...]
        m_new = jnp.maximum(m_prev, jnp.max(s, axis=-1, keepdims=True))
        alpha = jnp.exp(m_prev - m_new)
        p = jnp.exp(s - m_new)
        if mask_mode is not None or kv_valid_len is not None:
            # per-row fix: rows whose running max is still the sentinel are
            # fully masked so far; exp(NEG_INF - NEG_INF) == 1 must be zeroed.
            row_alive = m_new > 0.5 * NEG_INF
            p = jnp.where(row_alive, p, 0.0)

        l_sc[...] = alpha * l_sc[...] + jnp.sum(p, axis=-1, keepdims=True)
        acc_sc[...] = alpha * acc_sc[...] + jnp.dot(
            p.astype(cdt), vp_ref[0], preferred_element_type=jnp.float32)
        m_sc[...] = m_new

    if has_tile_tbl:
        if mask_mode == "2d":
            idx = qi * nk + ki
        else:
            idx = (b * nq + qi) * nk + ki
        pl.when(tbl_ref[idx] != 0)(_body)   # skip fully-masked kv tiles
    else:
        _body()

    # ---- finalize ------------------------------------------------------------
    @pl.when(ki == pl.num_programs(2) - 1)
    def _():
        inv_l = pl.reciprocal(l_sc[...], approx=True)
        o_ref[0] = (acc_sc[...] * inv_l).astype(o_ref.dtype)


# -----------------------------------------------------------------------------
# Wrapper
# -----------------------------------------------------------------------------
def attention_head(q, k, v, params, mask=None, *, head_dim=None,
                   q_tile=256, kv_tile=256, compute_dtype=jnp.bfloat16,
                   vmem_limit_bytes=None):
    """Pallas implementation of AttentionHead.forward.

    q, k, v : (B, S, E).  mask: optional (S, S), (1, S, S) or (B, S, S);
              nonzero = keep.  params: wq/wk/wv (E, D), bq/bk/bv (1, D) or (D,).
    Returns: (B, S, D) in q.dtype.  (attn_dropout has p=0.0 -> identity.)
    """
    B, S, E = q.shape
    D = head_dim if head_dim is not None else params["wq"].shape[1]
    scale = float(D) ** -0.5
    cdt = jnp.dtype(compute_dtype)

    if vmem_limit_bytes is None:
        try:  # re-budget per generation (v7x has only 64 MiB per TensorCore)
            cap = int(pltpu.get_tpu_info().vmem_capacity_bytes)
            vmem_limit_bytes = min((cap * 3) // 4, 96 * 1024 * 1024)
        except Exception:
            vmem_limit_bytes = 48 * 1024 * 1024

    # ---- deterministic tiling: pad S up, never fall back to tq=tk=S ---------
    q_mult = 16 if cdt == jnp.bfloat16 else 8
    tq = _round_up(min(q_tile, _round_up(S, q_mult)), q_mult)
    tk = _round_up(min(kv_tile, _round_up(S, 128)), 128)
    Sq = _round_up(S, tq)
    Sk = _round_up(S, tk)
    nq, nk = Sq // tq, Sk // tk

    def _pad_seq(x, target):
        if x.shape[1] == target:
            return x
        return jnp.pad(x, ((0, 0), (0, target - x.shape[1]), (0, 0)))

    q_in = _pad_seq(q, Sq)
    k_in = _pad_seq(k, Sk)
    v_in = _pad_seq(v, Sk)

    # ---- weights: fold 1/sqrt(D) into wq/bq; MXU inputs in compute dtype ----
    wq = (jnp.asarray(params["wq"], jnp.float32) * scale).astype(cdt)
    wk = jnp.asarray(params["wk"], jnp.float32).astype(cdt)
    wv = jnp.asarray(params["wv"], jnp.float32).astype(cdt)
    bq = jnp.asarray(params["bq"], jnp.float32).reshape(1, D) * scale  # f32
    bk = jnp.asarray(params["bk"], jnp.float32).reshape(1, D)
    bv = jnp.asarray(params["bv"], jnp.float32).reshape(1, D)

    # ---- pre-project K/V once (no per-q-tile re-projection / re-streaming) --
    kp, vp = _project_kv(k_in, v_in, wk, wv, bk, bv, tile=tk,
                         compute_dtype=cdt, vmem_limit_bytes=vmem_limit_bytes)

    # ---- mask handling + fully-masked-tile skip table ------------------------
    kv_valid_len = None
    if mask is None:
        mask_mode = None
        mask_args, mask_specs = (), []
        tbl_args, has_tbl, num_prefetch = (), False, 0
        if Sk > S:
            kv_valid_len = S  # padded kv columns masked in-kernel via iota
    else:
        m = jnp.asarray(mask)
        if m.ndim == 3 and m.shape[0] == 1:
            m = m[0]
        m_i8 = (m != 0).astype(jnp.int8)
        if m_i8.ndim == 2:
            mask_mode = "2d"
            m_i8 = jnp.pad(m_i8, ((0, Sq - S), (0, Sk - S)))
            tbl = (m_i8.reshape(nq, tq, nk, tk) != 0).any(axis=(1, 3))
            mask_specs = [pl.BlockSpec((tq, tk),
                                       lambda b, qi, ki, *_: (qi, ki))]
        else:
            mask_mode = "3d"
            m_i8 = jnp.pad(m_i8, ((0, 0), (0, Sq - S), (0, Sk - S)))
            tbl = (m_i8.reshape(B, nq, tq, nk, tk) != 0).any(axis=(2, 4))
            mask_specs = [pl.BlockSpec((1, tq, tk),
                                       lambda b, qi, ki, *_: (b, qi, ki))]
        mask_args = (m_i8,)
        tbl_args = (tbl.reshape(-1).astype(jnp.int32),)
        has_tbl, num_prefetch = True, 1

    in_specs = (
        [pl.BlockSpec((1, tq, E), lambda b, qi, ki, *_: (b, qi, 0)),   # q
         pl.BlockSpec((1, tk, D), lambda b, qi, ki, *_: (b, ki, 0)),   # kp
         pl.BlockSpec((1, tk, D), lambda b, qi, ki, *_: (b, ki, 0))]   # vp
        + mask_specs
        + [pl.BlockSpec((E, D), lambda b, qi, ki, *_: (0, 0)),         # wq (resident)
           pl.BlockSpec((1, D), lambda b, qi, ki, *_: (0, 0))])        # bq

    kernel = functools.partial(
        _flash_attn_kernel, mask_mode=mask_mode, has_tile_tbl=has_tbl,
        nq=nq, nk=nk, tk=tk, kv_valid_len=kv_valid_len, compute_dtype=cdt)

    out = pl.pallas_call(
        kernel,
        out_shape=jax.ShapeDtypeStruct((B, Sq, D), q.dtype),
        grid_spec=pltpu.PrefetchScalarGridSpec(
            num_scalar_prefetch=num_prefetch,
            grid=(B, nq, nk),
            in_specs=in_specs,
            out_specs=pl.BlockSpec((1, tq, D), lambda b, qi, ki, *_: (b, qi, 0)),
            scratch_shapes=[
                pltpu.VMEM((tq, D), cdt),          # projected, pre-scaled Q
                pltpu.VMEM((tq, 1), jnp.float32),  # running max m
                pltpu.VMEM((tq, 1), jnp.float32),  # running denom l
                pltpu.VMEM((tq, D), jnp.float32),  # output accumulator
            ]),
        compiler_params=pltpu.CompilerParams(
            dimension_semantics=("parallel", "parallel", "arbitrary"),
            vmem_limit_bytes=vmem_limit_bytes),
    )(*tbl_args, q_in, kp, vp, *mask_args, wq, bq)

    return out if Sq == S else out[:, :S]


# -----------------------------------------------------------------------------
# Pure-JAX reference mirroring the PyTorch forward.
# -----------------------------------------------------------------------------
def _reference(q, k, v, params, mask, head_dim):
    scale = float(head_dim) ** -0.5
    qp = q @ params["wq"] + params["bq"]
    kp = k @ params["wk"] + params["bk"]
    vp = v @ params["wv"] + params["bv"]
    s = jnp.einsum("bqd,bkd->bqk", qp, kp) * scale
    if mask is not None:
        m = mask if mask.ndim == 3 else mask[None]
        s = jnp.where(m == 0, -jnp.inf, s)
    w = jax.nn.softmax(s, axis=-1)
    return jnp.einsum("bqk,bkd->bqd", w, vp)


if __name__ == "__main__":
    # Small shapes consistent with the module: (B, S, E) inputs, head_dim D.
    B, S, E, D = 2, 8, 32, 16

    key = jax.random.PRNGKey(0)
    keys = jax.random.split(key, 9)

    q = jax.random.normal(keys[0], (B, S, E), dtype=jnp.float32)
    k = jax.random.normal(keys[1], (B, S, E), dtype=jnp.float32)
    v = jax.random.normal(keys[2], (B, S, E), dtype=jnp.float32)

    bound = 1.0 / (E ** 0.5)
    params = {
        "wq": jax.random.uniform(keys[3], (E, D), jnp.float32, -bound, bound),
        "wk": jax.random.uniform(keys[4], (E, D), jnp.float32, -bound, bound),
        "wv": jax.random.uniform(keys[5], (E, D), jnp.float32, -bound, bound),
        "bq": jax.random.uniform(keys[6], (1, D), jnp.float32, -bound, bound),
        "bk": jax.random.uniform(keys[7], (1, D), jnp.float32, -bound, bound),
        "bv": jax.random.uniform(keys[8], (1, D), jnp.float32, -bound, bound),
    }

    # Causal lower-triangular mask (2-D, shared across batch).
    mask = jnp.tril(jnp.ones((S, S), dtype=jnp.int32))
    ref = _reference(q, k, v, params, mask, D)

    # Default bf16 MXU path, 2-D mask.
    out = jax.block_until_ready(
        attention_head(q, k, v, params, mask=mask, head_dim=D))
    assert out.shape == (B, S, D)
    assert jnp.allclose(out, ref, atol=3e-2, rtol=3e-2), "mismatch (bf16, 2d mask)"

    # Per-batch (B, S, S) mask path.
    mask3 = jnp.broadcast_to(mask[None], (B, S, S))
    out3 = jax.block_until_ready(
        attention_head(q, k, v, params, mask=mask3, head_dim=D))
    assert jnp.allclose(out3, ref, atol=3e-2, rtol=3e-2), "mismatch (bf16, 3d mask)"

    # No-mask path (exercises padded-kv iota masking).
    out_nm = jax.block_until_ready(attention_head(q, k, v, params, head_dim=D))
    ref_nm = _reference(q, k, v, params, None, D)
    assert jnp.allclose(out_nm, ref_nm, atol=3e-2, rtol=3e-2), "mismatch (no mask)"

    # Full-precision f32 MXU path; tighter tolerance.
    out_f32 = jax.block_until_ready(
        attention_head(q, k, v, params, mask=mask, head_dim=D,
                       compute_dtype=jnp.float32))
    assert jnp.allclose(out_f32, ref, atol=5e-3, rtol=5e-3), "mismatch (f32)"

    print("KERNEL_OK")
</pallas_src>

<mosaic_0001>
module attributes {stable_mosaic.version = 11 : i64} {
  func.func @_kv_proj_kernel(%arg0: i32, %arg1: i32, %arg2: memref<1x128x32xf32, #tpu.memory_space<vmem>>, %arg3: memref<1x128x32xf32, #tpu.memory_space<vmem>>, %arg4: memref<32x16xbf16, #tpu.memory_space<vmem>>, %arg5: memref<32x16xbf16, #tpu.memory_space<vmem>>, %arg6: memref<1x16xf32, #tpu.memory_space<vmem>>, %arg7: memref<1x16xf32, #tpu.memory_space<vmem>>, %arg8: memref<1x128x16xbf16, #tpu.memory_space<vmem>>, %arg9: memref<1x128x16xbf16, #tpu.memory_space<vmem>>) attributes {dimension_semantics = [#tpu.dimension_semantics<parallel>, #tpu.dimension_semantics<parallel>], iteration_bounds = array<i64: 2, 1>, scalar_prefetch = 0 : i64, scratch_operands = 0 : i64, tpu.core_type = #tpu.core_type<tc>, window_params = [{transform_indices = @transform_0, window_bounds = array<i64: 1, 128, 32>}, {transform_indices = @transform_1, window_bounds = array<i64: 1, 128, 32>}, {pipeline_mode = #tpu.pipeline_mode<synchronous>, transform_indices = @transform_2, window_bounds = array<i64: 32, 16>}, {pipeline_mode = #tpu.pipeline_mode<synchronous>, transform_indices = @transform_3, window_bounds = array<i64: 32, 16>}, {pipeline_mode = #tpu.pipeline_mode<synchronous>, transform_indices = @transform_4, window_bounds = array<i64: 1, 16>}, {pipeline_mode = #tpu.pipeline_mode<synchronous>, transform_indices = @transform_5, window_bounds = array<i64: 1, 16>}, {transform_indices = @transform_6, window_bounds = array<i64: 1, 128, 16>}, {transform_indices = @transform_7, window_bounds = array<i64: 1, 128, 16>}]} {
    %c0 = arith.constant 0 : index
    %c0_0 = arith.constant 0 : index
    %c0_1 = arith.constant 0 : index
    %0 = vector.load %arg2[%c0, %c0_0, %c0_1] : memref<1x128x32xf32, #tpu.memory_space<vmem>>, vector<1x128x32xf32>
    %1 = vector.shape_cast %0 : vector<1x128x32xf32> to vector<128x32xf32>
    %2 = arith.truncf %1 : vector<128x32xf32> to vector<128x32xbf16>
    %c0_2 = arith.constant 0 : index
    %c0_3 = arith.constant 0 : index
    %3 = vector.load %arg4[%c0_2, %c0_3] : memref<32x16xbf16, #tpu.memory_space<vmem>>, vector<32x16xbf16>
    %cst = arith.constant dense<0.000000e+00> : vector<128x16xf32>
    %4 = tpu.matmul %2, %3, %cst {dimension_numbers = #tpu.dot_dimension_numbers<[1], [0], [0], [1], [0, 0, 1, 1], [], []>} : vector<128x32xbf16>, vector<32x16xbf16>, vector<128x16xf32> -> vector<128x16xf32>
    %c0_4 = arith.constant 0 : index
    %c0_5 = arith.constant 0 : index
    %5 = vector.load %arg6[%c0_4, %c0_5] : memref<1x16xf32, #tpu.memory_space<vmem>>, vector<1x16xf32>
    %6 = vector.broadcast %5 : vector<1x16xf32> to vector<128x16xf32>
    %7 = arith.addf %4, %6 : vector<128x16xf32>
    %c0_6 = arith.constant 0 : index
    %c0_7 = arith.constant 0 : index
    %c0_8 = arith.constant 0 : index
    %8 = vector.load %arg3[%c0_6, %c0_7, %c0_8] : memref<1x128x32xf32, #tpu.memory_space<vmem>>, vector<1x128x32xf32>
    %9 = vector.shape_cast %8 : vector<1x128x32xf32> to vector<128x32xf32>
    %10 = arith.truncf %9 : vector<128x32xf32> to vector<128x32xbf16>
    %c0_9 = arith.constant 0 : index
    %c0_10 = arith.constant 0 : index
    %11 = vector.load %arg5[%c0_9, %c0_10] : memref<32x16xbf16, #tpu.memory_space<vmem>>, vector<32x16xbf16>
    %cst_11 = arith.constant dense<0.000000e+00> : vector<128x16xf32>
    %12 = tpu.matmul %10, %11, %cst_11 {dimension_numbers = #tpu.dot_dimension_numbers<[1], [0], [0], [1], [0, 0, 1, 1], [], []>} : vector<128x32xbf16>, vector<32x16xbf16>, vector<128x16xf32> -> vector<128x16xf32>
    %c0_12 = arith.constant 0 : index
    %c0_13 = arith.constant 0 : index
    %13 = vector.load %arg7[%c0_12, %c0_13] : memref<1x16xf32, #tpu.memory_space<vmem>>, vector<1x16xf32>
    %14 = vector.broadcast %13 : vector<1x16xf32> to vector<128x16xf32>
    %15 = arith.addf %12, %14 : vector<128x16xf32>
    %16 = arith.truncf %7 : vector<128x16xf32> to vector<128x16xbf16>
    %c0_14 = arith.constant 0 : index
    %c0_15 = arith.constant 0 : index
    %c0_16 = arith.constant 0 : index
    %17 = vector.load %arg8[%c0_14, %c0_15, %c0_16] : memref<1x128x16xbf16, #tpu.memory_space<vmem>>, vector<1x128x16xbf16>
    %18 = vector.shape_cast %17 : vector<1x128x16xbf16> to vector<128x16xbf16>
    %19 = vector.shape_cast %16 : vector<128x16xbf16> to vector<1x128x16xbf16>
    tpu.vector_store %arg8[%c0_14, %c0_15, %c0_16], %19 {strides = array<i32>} : memref<1x128x16xbf16, #tpu.memory_space<vmem>>, vector<1x128x16xbf16>,
    %20 = arith.truncf %15 : vector<128x16xf32> to vector<128x16xbf16>
    %c0_17 = arith.constant 0 : index
    %c0_18 = arith.constant 0 : index
    %c0_19 = arith.constant 0 : index
    %21 = vector.load %arg9[%c0_17, %c0_18, %c0_19] : memref<1x128x16xbf16, #tpu.memory_space<vmem>>, vector<1x128x16xbf16>
    %22 = vector.shape_cast %21 : vector<1x128x16xbf16> to vector<128x16xbf16>
    %23 = vector.shape_cast %20 : vector<128x16xbf16> to vector<1x128x16xbf16>
    tpu.vector_store %arg9[%c0_17, %c0_18, %c0_19], %23 {strides = array<i32>} : memref<1x128x16xbf16, #tpu.memory_space<vmem>>, vector<1x128x16xbf16>,
    return
  }
  func.func @transform_0(%arg0: i32, %arg1: i32) -> (i32, i32, i32) {
    %c0_i32 = arith.constant 0 : i32
    %c0_i32_0 = arith.constant 0 : i32
    return %arg0, %arg1, %c0_i32 : i32, i32, i32
  }
  func.func @transform_1(%arg0: i32, %arg1: i32) -> (i32, i32, i32) {
    %c0_i32 = arith.constant 0 : i32
    %c0_i32_0 = arith.constant 0 : i32
    return %arg0, %arg1, %c0_i32 : i32, i32, i32
  }
  func.func @transform_2(%arg0: i32, %arg1: i32) -> (i32, i32) {
    %c0_i32 = arith.constant 0 : i32
    %c0_i32_0 = arith.constant 0 : i32
    %c0_i32_1 = arith.constant 0 : i32
    return %c0_i32, %c0_i32_0 : i32, i32
  }
  func.func @transform_3(%arg0: i32, %arg1: i32) -> (i32, i32) {
    %c0_i32 = arith.constant 0 : i32
    %c0_i32_0 = arith.constant 0 : i32
    %c0_i32_1 = arith.constant 0 : i32
    return %c0_i32, %c0_i32_0 : i32, i32
  }
  func.func @transform_4(%arg0: i32, %arg1: i32) -> (i32, i32) {
    %c0_i32 = arith.constant 0 : i32
    %c0_i32_0 = arith.constant 0 : i32
    %c0_i32_1 = arith.constant 0 : i32
    return %c0_i32, %c0_i32_0 : i32, i32
  }
  func.func @transform_5(%arg0: i32, %arg1: i32) -> (i32, i32) {
    %c0_i32 = arith.constant 0 : i32
    %c0_i32_0 = arith.constant 0 : i32
    %c0_i32_1 = arith.constant 0 : i32
    return %c0_i32, %c0_i32_0 : i32, i32
  }
  func.func @transform_6(%arg0: i32, %arg1: i32) -> (i32, i32, i32) {
    %c0_i32 = arith.constant 0 : i32
    %c0_i32_0 = arith.constant 0 : i32
    return %arg0, %arg1, %c0_i32 : i32, i32, i32
  }
  func.func @transform_7(%arg0: i32, %arg1: i32) -> (i32, i32, i32) {
    %c0_i32 = arith.constant 0 : i32
    %c0_i32_0 = arith.constant 0 : i32
    return %arg0, %arg1, %c0_i32 : i32, i32, i32
  }
}

</mosaic_0001>

<bundles_post_ra>
// kernel: tpu_custom_call.1
= control target key start
LH: loop header
LB: loop body
LE: loop exit
PB: predicated region body
PF: predicated region fallthrough
CT: control target
= control target key end

     0   :  { %s1289_s24 = smov 0   ;;  %s1291_s25 = smov 0   ;;  %s1506_s0 = inlined_call_operand.vmem [shape: f32[2,128,32], index: 0, kind: input, shape index: {}]   ;;  %s1507_s1 = inlined_call_operand.vmem [shape: f32[2,128,32], index: 1, kind: input, shape index: {}]   ;;  %s1508_s2 = inlined_call_operand.vmem [shape: bf16[32,16], index: 2, kind: input, shape index: {}]   ;;  %s1509_s3 = inlined_call_operand.vmem [shape: bf16[32,16], index: 3, kind: input, shape index: {}]   ;;  %s1510_s4 = inlined_call_operand.vmem [shape: f32[1,16], index: 4, kind: input, shape index: {}]   ;;  %s1511_s5 = inlined_call_operand.vmem [shape: f32[1,16], index: 5, kind: input, shape index: {}]   ;;  %s1512_s6 = inlined_call_operand.vmem [shape: bf16[2,128,16], index: 6, kind: output, shape index: {0}]   ;;  %s1513_s7 = inlined_call_operand.vmem [shape: bf16[2,128,16], index: 7, kind: output, shape index: {1}]  }
   0x1   :  { %s1293_s26 = smov 0  }
   0x2 LB: > { %s30_s27 = sadd.s32 1, %s1243_s25  ;;  %p1036_p0 = scmp.ge.s32.totalorder %s1247_s26, 1  ;;  %s1247_s26 = sphi %s1293_s26, %s18_s26   ;;  %s1243_s25 = sphi %s1291_s25, %s1515_s25   ;;  %s1239_s24 = sphi %s1289_s24, %s1514_s24  }
   0x3   : > { %p32_p1 = scmp.ge.s32.totalorder %s30_s27, 2  ;;  %p280_p2 = scmp.lt.s32.totalorder %s1247_s26, 3 }
   0x5   : > { %s1517_s27 = smov (%p32_p1, %s30_s27), 0  ;;  %p281_p3 = pnand %p1036_p0, %p280_p2 }
   0x6   : > { %v1221_v0 = vld [vmem:[%s1508_s2] sm:$0xff] (!%p281_p3)   ;;  %p339_p4 = scmp.lt.s32.totalorder (!%p281_p3), %s1239_s24, 1  ;;  %v1223_v2 = vld [vmem:[%s1508_s2 + $0x8] sm:$0xff] (!%p281_p3)   ;;  %vm426_vm0 = vcmask (!%p281_p3), 261120   ;;  %vm780_vm1 = vcmask (!%p281_p3), 125952  }
   0x7   : > { %284 = sbr.rel (%p281_p3) target bundleno = 266 (0x10a), region = 44  ;;  %v1222_v1 = vld [vmem:[%s1509_s3] sm:$0xff] (!%p281_p3)   ;;  %1157 = vmatprep.subr.bf16.mxu0 (!%p281_p3), %v1221_v0  ;;  %v1224_v3 = vld [vmem:[%s1509_s3 + $0x8] sm:$0xff] (!%p281_p3)  }
   0x8   : > { %1177 = vmatprep.subr.bf16.mxu1 (!%p281_p3), %v1222_v1  ;;  %1158 = vmatpush3.bf16.msra.mxu0 (!%p281_p3), %v1221_v0  ;;  %v1383_v52 = vld [vmem:[%s1510_s4] ss:$0 sm:$0xff] (!%p281_p3) }
   0x9   : > { %1178 = vmatpush3.bf16.msra.mxu1 (!%p281_p3), %v1222_v1  ;;  %1159 = vmatprep.subr.bf16.mxu0 (!%p281_p3), %v1223_v2  ;;  %v1389_v53 = vld [vmem:[%s1511_s5] ss:$0 sm:$0xff] (!%p281_p3) }
   0xa   : > { %1179 = vmatprep.subr.bf16.mxu1 (!%p281_p3), %v1224_v3 }
   0xc   : > { %1160 = vmatpush3.bf16.msra.mxu0 (!%p281_p3), %v1223_v2 }
   0xd   : > { %1180 = vmatpush3.bf16.msra.mxu1 (!%p281_p3), %v1224_v3 }
   0xe   : > { %s1519_s24 = smov (!%p339_p4, %s1239_s24), 1 }
   0xf   : > { %s1101_s13 = sshll.u32 %s1519_s24, 7  ;;  %s1103_s22 = sshll.u32 %s1519_s24, 6 }
  0x10   : > { %s1325_s16 = scalar_lea.vmem %s1506_s0, %s1101_s13  ;;  %s1330_s19 = scalar_lea.vmem %s1507_s1, %s1101_s13 }
  0x11   : > { %v379_v4 = vld [vmem:[%s1325_s16] sm:$0xff]  ;;  %v380_v5 = vld [vmem:[%s1325_s16 + $0x8] sm:$0xff]  ;;  %v381_v9 = vld [vmem:[%s1325_s16 + $0x10] sm:$0xff]  ;;  %s1395_s8 = scalar_lea.vmem %s1512_s6, %s1103_s22  ;;  %s1402_s10 = scalar_lea.vmem %s1513_s7, %s1103_s22 }
  0x12   : > { %v548_v6 = vld [vmem:[%s1330_s19] sm:$0xff]  ;;  %v395_v7 = vpack.c.bf16 %v380_v5, %v379_v4  ;;  %v549_v8 = vld [vmem:[%s1330_s19 + $0x8] sm:$0xff]  ;;  %v382_v10 = vld [vmem:[%s1325_s16 + $0x18] sm:$0xff] }
  0x13   : > { %v564_v11 = vpack.c.bf16 %v549_v8, %v548_v6  ;;  %v396_v12 = vpack.c.bf16 %v382_v10, %v381_v9  ;;  %v550_v13 = vld [vmem:[%s1330_s19 + $0x10] sm:$0xff]  ;;  %v551_v14 = vld [vmem:[%s1330_s19 + $0x18] sm:$0xff]  ;;  %v383_v15 = vld [vmem:[%s1325_s16 + $0x20] sm:$0xff] }
  0x14   : > { %1161 = vmatprep.mubr.msk.bf16.mxu0 %vm426_vm0, %v395_v7  ;;  %v565_v16 = vpack.c.bf16 %v551_v14, %v550_v13  ;;  %v384_v17 = vld [vmem:[%s1325_s16 + $0x28] sm:$0xff]  ;;  %v552_v18 = vld [vmem:[%s1330_s19 + $0x20] sm:$0xff]  ;;  %v385_v22 = vld [vmem:[%s1325_s16 + $0x30] sm:$0xff] }
  0x15   : > { %v553_v19 = vld [vmem:[%s1330_s19 + $0x28] sm:$0xff]  ;;  %1181 = vmatprep.mubr.msk.bf16.mxu1 %vm426_vm0, %v564_v11  ;;  %1162 = vmatmul.mubr.msk.bf16.vlgmr.msra.gmra.mrb[0].mxu0 %vm426_vm0, %v396_v12  ;;  %v397_v20 = vpack.c.bf16 %v384_v17, %v383_v15  ;;  %v386_v23 = vld [vmem:[%s1325_s16 + $0x38] sm:$0xff]  ;;  %v554_v24 = vld [vmem:[%s1330_s19 + $0x30] sm:$0xff] }
  0x16   : > { %v566_v21 = vpack.c.bf16 %v553_v19, %v552_v18  ;;  %1182 = vmatmul.mubr.msk.bf16.vlgmr.msra.gmra.mrb[0].mxu1 %vm426_vm0, %v565_v16  ;;  %v555_v25 = vld [vmem:[%s1330_s19 + $0x38] sm:$0xff]  ;;  %v387_v26 = vld [vmem:[%s1325_s16 + $0x40] sm:$0xff]  ;;  %v388_v27 = vld [vmem:[%s1325_s16 + $0x48] sm:$0xff]  ;;  %v398_v30 = vpack.c.bf16 %v386_v23, %v385_v22 }
  0x17   : > { %1165 = vmatprep.mubr.msk.bf16.mxu0 %vm426_vm0, %v397_v20  ;;  %v556_v28 = vld [vmem:[%s1330_s19 + $0x40] sm:$0xff]  ;;  %v557_v29 = vld [vmem:[%s1330_s19 + $0x48] sm:$0xff]  ;;  %v567_v31 = vpack.c.bf16 %v555_v25, %v554_v24  ;;  %v399_v32 = vpack.c.bf16 %v388_v27, %v387_v26  ;;  %v389_v34 = vld [vmem:[%s1325_s16 + $0x50] sm:$0xff] }
  0x18   : > { %1185 = vmatprep.mubr.msk.bf16.mxu1 %vm426_vm0, %v566_v21  ;;  %v568_v33 = vpack.c.bf16 %v557_v29, %v556_v28  ;;  %v390_v35 = vld [vmem:[%s1325_s16 + $0x58] sm:$0xff]  ;;  %v558_v36 = vld [vmem:[%s1330_s19 + $0x50] sm:$0xff]  ;;  %v391_v38 = vld [vmem:[%s1325_s16 + $0x60] sm:$0xff] }
  0x19   : > { %v559_v37 = vld [vmem:[%s1330_s19 + $0x58] sm:$0xff]  ;;  %v392_v39 = vld [vmem:[%s1325_s16 + $0x68] sm:$0xff]  ;;  %v560_v40 = vld [vmem:[%s1330_s19 + $0x60] sm:$0xff]  ;;  %v400_v42 = vpack.c.bf16 %v390_v35, %v389_v34 }
  0x1a   : > { %v561_v41 = vld [vmem:[%s1330_s19 + $0x68] sm:$0xff]  ;;  %v569_v43 = vpack.c.bf16 %v559_v37, %v558_v36  ;;  %v401_v44 = vpack.c.bf16 %v392_v39, %v391_v38  ;;  %v393_v46 = vld [vmem:[%s1325_s16 + $0x70] sm:$0xff]  ;;  %v394_v47 = vld [vmem:[%s1325_s16 + $0x78] sm:$0xff] }
  0x1b   : > { %v570_v45 = vpack.c.bf16 %v561_v41, %v560_v40  ;;  %v562_v48 = vld [vmem:[%s1330_s19 + $0x70] sm:$0xff]  ;;  %v563_v49 = vld [vmem:[%s1330_s19 + $0x78] sm:$0xff]  ;;  %v402_v50 = vpack.c.bf16 %v394_v47, %v393_v46 }
  0x1c   : > { %v571_v51 = vpack.c.bf16 %v563_v49, %v562_v48 }
  0x1d   : > { %1166 = vmatmul.mubr.msk.bf16.gmra.mrb[4].mxu0 %vm426_vm0, %v398_v30 }
  0x1e   : > { %1186 = vmatmul.mubr.msk.bf16.gmra.mrb[4].mxu1 %vm426_vm0, %v567_v31  ;;  %1169 = vmatprep.mubr.msk.bf16.mxu0 %vm426_vm0, %v399_v32 }
  0x1f   : > { %1189 = vmatprep.mubr.msk.bf16.mxu1 %vm426_vm0, %v568_v33 }
  0x25   : > { %1170 = vmatmul.mubr.msk.bf16.gmra.mrb[8].mxu0 %vm426_vm0, %v400_v42 }
  0x26   : > { %1190 = vmatmul.mubr.msk.bf16.gmra.mrb[8].mxu1 %vm426_vm0, %v569_v43  ;;  %1173 = vmatprep.mubr.msk.bf16.mxu0 %vm426_vm0, %v401_v44 }
  0x27   : > { %1193 = vmatprep.mubr.msk.bf16.mxu1 %vm426_vm0, %v570_v45 }
  0x2d   : > { %1174 = vmatmul.mubr.msk.bf16.gmra.mrb[12].mxu0 %vm426_vm0, %v402_v50 }
  0x2e   : > { %1194 = vmatmul.mubr.msk.bf16.gmra.mrb[12].mxu1 %vm426_vm0, %v571_v51 }
  0xe8   : > { %v1163_v54 = vpop.f32.mrb[0].mxu0 }
  0xe9   : > { %v494_v55 = vadd.f32 %v1163_v54, %v1383_v52  ;;  %v1183_v56 = vpop.f32.mrb[0].mxu1  ;;  %v485_v57 = vpop.f32.mrb[1].mxu0 }
  0xea   : > { %v662_v58 = vadd.f32 %v1183_v56, %v1389_v53  ;;  %v486_v59 = vadd.f32 %v1383_v52, %v485_v57  ;;  %v653_v60 = vpop.f32.mrb[1].mxu1  ;;  %v1164_v61 = vpop.f32.mrb[2].mxu0 }
  0xeb   : > { %v1107_v62 = vpack.c.bf16 %v494_v55, %v494_v55  ;;  %v654_v63 = vadd.f32 %v1389_v53, %v653_v60  ;;  %v497_v0 = vadd.f32 %v1164_v61, %v1383_v52  ;;  %v1184_v1 = vpop.f32.mrb[2].mxu1  ;;  %v488_v2 = vpop.f32.mrb[3].mxu0 }
  0xec   : > { %v1123_v3 = vpack.c.bf16 %v662_v58, %v662_v58  ;;  %v1105_v4 = vpack.c.bf16 %v486_v59, %v486_v59  ;;  %v665_v5 = vadd.f32 %v1184_v1, %v1389_v53  ;;  %v489_v6 = vadd.f32 %v1383_v52, %v488_v2  ;;  %v656_v7 = vpop.f32.mrb[3].mxu1 }
  0xed   : > { %783 = vst.msk [vmem:[%s1395_s8 + $0x8] sm:$0xf] %vm780_vm1, %v1107_v62  ;;  %v1121_v8 = vpack.c.bf16 %v654_v63, %v654_v63  ;;  %v1108_v9 = vpack.c.bf16 %v497_v0, %v497_v0  ;;  %v657_v10 = vadd.f32 %v1389_v53, %v656_v7 }
  0xee   : > { %863 = vst.msk [vmem:[%s1402_s10 + $0x8] sm:$0xf] %vm780_vm1, %v1123_v3  ;;  %781 = vst.msk [vmem:[%s1395_s8] sm:$0xf] %vm780_vm1, %v1105_v4  ;;  %v1124_v11 = vpack.c.bf16 %v665_v5, %v665_v5  ;;  %v1106_v12 = vpack.c.bf16 %v489_v6, %v489_v6 }
  0xef   : > { %861 = vst.msk [vmem:[%s1402_s10] sm:$0xf] %vm780_vm1, %v1121_v8  ;;  %784 = vst.msk [vmem:[%s1395_s8 + $0xc] sm:$0xf] %vm780_vm1, %v1108_v9  ;;  %v1122_v13 = vpack.c.bf16 %v657_v10, %v657_v10 }
  0xf0   : > { %864 = vst.msk [vmem:[%s1402_s10 + $0xc] sm:$0xf] %vm780_vm1, %v1124_v11  ;;  %782 = vst.msk [vmem:[%s1395_s8 + $0x4] sm:$0xf] %vm780_vm1, %v1106_v12  ;;  %v1167_v14 = vpop.f32.mrb[4].mxu0 }
  0xf1   : > { %862 = vst.msk [vmem:[%s1402_s10 + $0x4] sm:$0xf] %vm780_vm1, %v1122_v13  ;;  %v510_v15 = vadd.f32 %v1167_v14, %v1383_v52  ;;  %v1187_v16 = vpop.f32.mrb[4].mxu1  ;;  %v501_v17 = vpop.f32.mrb[5].mxu0 }
  0xf2   : > { %v678_v18 = vadd.f32 %v1187_v16, %v1389_v53  ;;  %v502_v19 = vadd.f32 %v1383_v52, %v501_v17  ;;  %v669_v20 = vpop.f32.mrb[5].mxu1  ;;  %v1168_v21 = vpop.f32.mrb[6].mxu0 }
  0xf3   : > { %v1111_v22 = vpack.c.bf16 %v510_v15, %v510_v15  ;;  %v670_v23 = vadd.f32 %v1389_v53, %v669_v20  ;;  %v513_v24 = vadd.f32 %v1168_v21, %v1383_v52  ;;  %v1188_v25 = vpop.f32.mrb[6].mxu1  ;;  %v504_v26 = vpop.f32.mrb[7].mxu0 }
  0xf4   : > { %v1127_v27 = vpack.c.bf16 %v678_v18, %v678_v18  ;;  %v1109_v28 = vpack.c.bf16 %v502_v19, %v502_v19  ;;  %v681_v29 = vadd.f32 %v1188_v25, %v1389_v53  ;;  %v505_v30 = vadd.f32 %v1383_v52, %v504_v26  ;;  %v672_v31 = vpop.f32.mrb[7].mxu1 }
  0xf5   : > { %787 = vst.msk [vmem:[%s1395_s8 + $0x18] sm:$0xf] %vm780_vm1, %v1111_v22  ;;  %v1125_v32 = vpack.c.bf16 %v670_v23, %v670_v23  ;;  %v1112_v33 = vpack.c.bf16 %v513_v24, %v513_v24  ;;  %v673_v34 = vadd.f32 %v1389_v53, %v672_v31 }
  0xf6   : > { %867 = vst.msk [vmem:[%s1402_s10 + $0x18] sm:$0xf] %vm780_vm1, %v1127_v27  ;;  %785 = vst.msk [vmem:[%s1395_s8 + $0x10] sm:$0xf] %vm780_vm1, %v1109_v28  ;;  %v1128_v35 = vpack.c.bf16 %v681_v29, %v681_v29  ;;  %v1110_v36 = vpack.c.bf16 %v505_v30, %v505_v30 }
  0xf7   : > { %865 = vst.msk [vmem:[%s1402_s10 + $0x10] sm:$0xf] %vm780_vm1, %v1125_v32  ;;  %788 = vst.msk [vmem:[%s1395_s8 + $0x1c] sm:$0xf] %vm780_vm1, %v1112_v33  ;;  %v1126_v37 = vpack.c.bf16 %v673_v34, %v673_v34 }
  0xf8   : > { %868 = vst.msk [vmem:[%s1402_s10 + $0x1c] sm:$0xf] %vm780_vm1, %v1128_v35  ;;  %786 = vst.msk [vmem:[%s1395_s8 + $0x14] sm:$0xf] %vm780_vm1, %v1110_v36  ;;  %v1171_v38 = vpop.f32.mrb[8].mxu0 }
  0xf9   : > { %866 = vst.msk [vmem:[%s1402_s10 + $0x14] sm:$0xf] %vm780_vm1, %v1126_v37  ;;  %v526_v39 = vadd.f32 %v1171_v38, %v1383_v52  ;;  %v1191_v40 = vpop.f32.mrb[8].mxu1  ;;  %v517_v41 = vpop.f32.mrb[9].mxu0 }
  0xfa   : > { %v694_v42 = vadd.f32 %v1191_v40, %v1389_v53  ;;  %v518_v43 = vadd.f32 %v1383_v52, %v517_v41  ;;  %v685_v44 = vpop.f32.mrb[9].mxu1  ;;  %v1172_v45 = vpop.f32.mrb[10].mxu0 }
  0xfb   : > { %v1115_v46 = vpack.c.bf16 %v526_v39, %v526_v39  ;;  %v686_v47 = vadd.f32 %v1389_v53, %v685_v44  ;;  %v529_v48 = vadd.f32 %v1172_v45, %v1383_v52  ;;  %v1192_v49 = vpop.f32.mrb[10].mxu1  ;;  %v520_v50 = vpop.f32.mrb[11].mxu0 }
  0xfc   : > { %v1131_v51 = vpack.c.bf16 %v694_v42, %v694_v42  ;;  %v1113_v54 = vpack.c.bf16 %v518_v43, %v518_v43  ;;  %v697_v55 = vadd.f32 %v1192_v49, %v1389_v53  ;;  %v521_v56 = vadd.f32 %v1383_v52, %v520_v50  ;;  %v688_v57 = vpop.f32.mrb[11].mxu1 }
  0xfd   : > { %791 = vst.msk [vmem:[%s1395_s8 + $0x28] sm:$0xf] %vm780_vm1, %v1115_v46  ;;  %v1129_v58 = vpack.c.bf16 %v686_v47, %v686_v47  ;;  %v1116_v59 = vpack.c.bf16 %v529_v48, %v529_v48  ;;  %v689_v60 = vadd.f32 %v1389_v53, %v688_v57 }
  0xfe   : > { %871 = vst.msk [vmem:[%s1402_s10 + $0x28] sm:$0xf] %vm780_vm1, %v1131_v51  ;;  %789 = vst.msk [vmem:[%s1395_s8 + $0x20] sm:$0xf] %vm780_vm1, %v1113_v54  ;;  %v1132_v61 = vpack.c.bf16 %v697_v55, %v697_v55  ;;  %v1114_v62 = vpack.c.bf16 %v521_v56, %v521_v56 }
  0xff   : > { %869 = vst.msk [vmem:[%s1402_s10 + $0x20] sm:$0xf] %vm780_vm1, %v1129_v58  ;;  %792 = vst.msk [vmem:[%s1395_s8 + $0x2c] sm:$0xf] %vm780_vm1, %v1116_v59  ;;  %v1130_v63 = vpack.c.bf16 %v689_v60, %v689_v60 }
 0x100   : > { %872 = vst.msk [vmem:[%s1402_s10 + $0x2c] sm:$0xf] %vm780_vm1, %v1132_v61  ;;  %790 = vst.msk [vmem:[%s1395_s8 + $0x24] sm:$0xf] %vm780_vm1, %v1114_v62  ;;  %v1175_v0 = vpop.f32.mrb[12].mxu0 }
 0x101   : > { %870 = vst.msk [vmem:[%s1402_s10 + $0x24] sm:$0xf] %vm780_vm1, %v1130_v63  ;;  %v542_v1 = vadd.f32 %v1175_v0, %v1383_v52  ;;  %v1195_v2 = vpop.f32.mrb[12].mxu1  ;;  %v533_v3 = vpop.f32.mrb[13].mxu0 }
 0x102   : > { %v710_v4 = vadd.f32 %v1195_v2, %v1389_v53  ;;  %v534_v5 = vadd.f32 %v1383_v52, %v533_v3  ;;  %v701_v6 = vpop.f32.mrb[13].mxu1  ;;  %v1176_v7 = vpop.f32.mrb[14].mxu0 }
 0x103   : > { %v1119_v8 = vpack.c.bf16 %v542_v1, %v542_v1  ;;  %v702_v9 = vadd.f32 %v1389_v53, %v701_v6  ;;  %v545_v10 = vadd.f32 %v1176_v7, %v1383_v52  ;;  %v1196_v11 = vpop.f32.mrb[14].mxu1  ;;  %v536_v12 = vpop.f32.mrb[15].mxu0 }
 0x104   : > { %v1135_v13 = vpack.c.bf16 %v710_v4, %v710_v4  ;;  %v1117_v14 = vpack.c.bf16 %v534_v5, %v534_v5  ;;  %v713_v15 = vadd.f32 %v1196_v11, %v1389_v53  ;;  %v537_v16 = vadd.f32 %v1383_v52, %v536_v12  ;;  %v704_v17 = vpop.f32.mrb[15].mxu1 }
 0x105   : > { %795 = vst.msk [vmem:[%s1395_s8 + $0x38] sm:$0xf] %vm780_vm1, %v1119_v8  ;;  %v1133_v18 = vpack.c.bf16 %v702_v9, %v702_v9  ;;  %v1120_v19 = vpack.c.bf16 %v545_v10, %v545_v10  ;;  %v705_v20 = vadd.f32 %v1389_v53, %v704_v17 }
 0x106   : > { %875 = vst.msk [vmem:[%s1402_s10 + $0x38] sm:$0xf] %vm780_vm1, %v1135_v13  ;;  %793 = vst.msk [vmem:[%s1395_s8 + $0x30] sm:$0xf] %vm780_vm1, %v1117_v14  ;;  %v1136_v21 = vpack.c.bf16 %v713_v15, %v713_v15  ;;  %v1118_v22 = vpack.c.bf16 %v537_v16, %v537_v16 }
 0x107   : > { %873 = vst.msk [vmem:[%s1402_s10 + $0x30] sm:$0xf] %vm780_vm1, %v1133_v18  ;;  %796 = vst.msk [vmem:[%s1395_s8 + $0x3c] sm:$0xf] %vm780_vm1, %v1120_v19  ;;  %v1134_v23 = vpack.c.bf16 %v705_v20, %v705_v20 }
 0x108   : > { %876 = vst.msk [vmem:[%s1402_s10 + $0x3c] sm:$0xf] %vm780_vm1, %v1136_v21  ;;  %794 = vst.msk [vmem:[%s1395_s8 + $0x34] sm:$0xf] %vm780_vm1, %v1118_v22 }
 0x109   : > { %874 = vst.msk [vmem:[%s1402_s10 + $0x34] sm:$0xf] %vm780_vm1, %v1134_v23 }
 0x10a PF: > { %s18_s26 = sadd.s32 1, %s1247_s26   ;;  %s1514_s24 = smov %s1243_s25 }
 0x10b   : > { %p15_p5 = scmp.ge.s32.totalorder %s18_s26, 4   ;;  %s1515_s25 = smov %s1517_s27 }
 0x10d   :  { %17 = sbr.rel (!%p15_p5) target bundleno = 2 (0x2), region = 89 }

</bundles_post_ra>
